<compile_context>
chip_gen: v5e
topology: v5e:2x2
jax: 0.10.0
libtpu: 0.0.40
codegen_flags: <defaults>
</compile_context>

<pallas_src>
import jax
import jax.numpy as jnp
import numpy as np
from jax.experimental import pallas as pl
from jax.experimental.pallas import tpu as pltpu  # noqa: F401  (kept for TPU-specific tuning hooks)


def _ctlstm_kernel(xcat_ref, c_ref, cbar_ref, w_ref, out_ref):
    H = c_ref.shape[-1]

    # gates: (B, 8H) — columns [i | f | o | ibar | fbar | c | decay | pad]
    # Bias is already folded in via the ones column of xcat.
    gates = jnp.dot(xcat_ref[...], w_ref[...],
                    preferred_element_type=jnp.float32)

    # One sigmoid over the contiguous block of the 5 sigmoid gates.
    sig = jax.nn.sigmoid(gates[:, :5 * H])
    i_g  = sig[:, 0 * H:1 * H]
    f_g  = sig[:, 1 * H:2 * H]
    o_g  = sig[:, 2 * H:3 * H]
    ibar = sig[:, 3 * H:4 * H]
    fbar = sig[:, 4 * H:5 * H]

    c_g   = jnp.tanh(gates[:, 5 * H:6 * H])
    decay = gates[:, 6 * H:7 * H]

    _c    = f_g * c_ref[...] + i_g * c_g
    _cbar = fbar * cbar_ref[...] + ibar * c_g
    # Softplus with PyTorch defaults (beta=1, threshold=20):
    #   x if x > 20 else log1p(exp(x))
    _delt = jnp.where(decay > 20.0, decay,
                      jnp.log1p(jnp.exp(jnp.minimum(decay, 20.0))))

    # Single lane-dense store: (B, 4H) = [c | cbar | delt | o].
    out_ref[...] = jnp.concatenate([_c, _cbar, _delt, o_g],
                                   axis=-1).astype(out_ref.dtype)


def ctlstm_cell(x, hidden, w_ih, b_ih, w_hh, b_hh):
    """hidden = (h_t, c_t, cbarx), each (B, H). Returns (_c, _cbar, _delt, o)."""
    h_t, c_t, cbarx = hidden
    B, D = x.shape
    H = h_t.shape[-1]

    # PyTorch gate order is [i, f, c, o, ibar, fbar, decay]; reorder the rows
    # so all sigmoid gates are contiguous: [i, f, o, ibar, fbar, c, decay].
    perm = (0, 1, 3, 4, 5, 2, 6)

    def reorder_rows(w):  # w: (7H, ...) blocked in chunks of H along axis 0
        return jnp.concatenate([w[k * H:(k + 1) * H] for k in perm], axis=0)

    w_ih_r = reorder_rows(w_ih)                                    # (7H, D)
    w_hh_r = reorder_rows(w_hh)                                    # (7H, H)
    b_r    = reorder_rows((b_ih + b_hh)[:, None]).T                # (1, 7H)

    # Stacked weight: rows [W_ih^T ; W_hh^T ; bias], columns padded 7H -> 8H
    # so the gate axis is a multiple of 128 lanes (224 -> 256 for H=32).
    w_stack = jnp.concatenate([w_ih_r.T, w_hh_r.T, b_r], axis=0)   # (D+H+1, 7H)
    w_stack = jnp.pad(w_stack, ((0, 0), (0, H)))                   # (D+H+1, 8H)

    # Input with a ones column so the single matmul absorbs the bias.
    xcat = jnp.concatenate(
        [x, h_t, jnp.ones((B, 1), x.dtype)], axis=-1)              # (B, D+H+1)

    # No grid: whole problem fits VMEM as full-array blocks; avoids the
    # pipeline prologue/epilogue of a 1-point grid.
    out = pl.pallas_call(
        _ctlstm_kernel,
        out_shape=jax.ShapeDtypeStruct((B, 4 * H), x.dtype),
    )(xcat, c_t, cbarx, w_stack)

    _c    = out[:, 0 * H:1 * H]
    _cbar = out[:, 1 * H:2 * H]
    _delt = out[:, 2 * H:3 * H]
    o_g   = out[:, 3 * H:4 * H]
    return _c, _cbar, _delt, o_g


def _reference(x, hidden, w_ih, b_ih, w_hh, b_hh):
    h_t, c_t, cbarx = hidden
    H = h_t.shape[-1]
    gates = x @ w_ih.T + b_ih + h_t @ w_hh.T + b_hh
    chunks = [gates[:, k * H:(k + 1) * H] for k in range(7)]
    i, f, c, o, ibar, fbar, decay = chunks
    i, f, o = jax.nn.sigmoid(i), jax.nn.sigmoid(f), jax.nn.sigmoid(o)
    ibar, fbar = jax.nn.sigmoid(ibar), jax.nn.sigmoid(fbar)
    c = jnp.tanh(c)
    _c = f * c_t + i * c
    _cbar = fbar * cbarx + ibar * c
    _delt = jnp.where(decay > 20.0, decay,
                      jnp.log1p(jnp.exp(jnp.minimum(decay, 20.0))))
    return _c, _cbar, _delt, o


if __name__ == "__main__":
    B, D, H = 8, 32, 32
    key = jax.random.PRNGKey(0)
    kx, kh, kc, kcb, k1, k2, k3, k4 = jax.random.split(key, 8)

    x = jax.random.normal(kx, (B, D), jnp.float32)
    h_t = jax.random.normal(kh, (B, H), jnp.float32)
    c_t = jax.random.normal(kc, (B, H), jnp.float32)
    cbarx = jax.random.normal(kcb, (B, H), jnp.float32)

    # nn.Linear default init: U(-1/sqrt(fan_in), 1/sqrt(fan_in)) for weight and bias.
    k_ih = 1.0 / np.sqrt(D)
    k_hh = 1.0 / np.sqrt(H)
    w_ih = jax.random.uniform(k1, (7 * H, D), jnp.float32, -k_ih, k_ih)
    b_ih = jax.random.uniform(k2, (7 * H,), jnp.float32, -k_ih, k_ih)
    w_hh = jax.random.uniform(k3, (7 * H, H), jnp.float32, -k_hh, k_hh)
    b_hh = jax.random.uniform(k4, (7 * H,), jnp.float32, -k_hh, k_hh)

    outs = ctlstm_cell(x, (h_t, c_t, cbarx), w_ih, b_ih, w_hh, b_hh)
    outs = jax.block_until_ready(outs)

    refs = _reference(x, (h_t, c_t, cbarx), w_ih, b_ih, w_hh, b_hh)
    for got, want in zip(outs, refs):
        np.testing.assert_allclose(np.asarray(got), np.asarray(want),
                                   rtol=1e-5, atol=1e-5)

    print("KERNEL_OK")
</pallas_src>

<mosaic_0001>
module attributes {stable_mosaic.version = 11 : i64} {
  func.func @_ctlstm_kernel(%arg0: memref<8x65xf32, #tpu.memory_space<vmem>>, %arg1: memref<8x32xf32, #tpu.memory_space<vmem>>, %arg2: memref<8x32xf32, #tpu.memory_space<vmem>>, %arg3: memref<65x256xf32, #tpu.memory_space<vmem>>, %arg4: memref<8x128xf32, #tpu.memory_space<vmem>>) attributes {dimension_semantics = [], scalar_prefetch = 0 : i64, scratch_operands = 0 : i64, tpu.core_type = #tpu.core_type<tc>} {
    %c0 = arith.constant 0 : index
    %c0_0 = arith.constant 0 : index
    %0 = vector.load %arg0[%c0, %c0_0] : memref<8x65xf32, #tpu.memory_space<vmem>>, vector<8x65xf32>
    %c0_1 = arith.constant 0 : index
    %c0_2 = arith.constant 0 : index
    %1 = vector.load %arg3[%c0_1, %c0_2] : memref<65x256xf32, #tpu.memory_space<vmem>>, vector<65x256xf32>
    %cst = arith.constant dense<0.000000e+00> : vector<8x256xf32>
    %2 = tpu.matmul %0, %1, %cst {dimension_numbers = #tpu.dot_dimension_numbers<[1], [0], [0], [1], [0, 0, 1, 1], [], []>} : vector<8x65xf32>, vector<65x256xf32>, vector<8x256xf32> -> vector<8x256xf32>
    %3 = vector.extract_strided_slice %2 {offsets = [0, 0], sizes = [8, 160], strides = [1, 1]} : vector<8x256xf32> to vector<8x160xf32>
    %4 = arith.negf %3 : vector<8x160xf32>
    %5 = math.exp %4 : vector<8x160xf32>
    %cst_3 = arith.constant 1.000000e+00 : f32
    %6 = vector.broadcast %cst_3 : f32 to vector<8x160xf32>
    %7 = arith.addf %6, %5 : vector<8x160xf32>
    %8 = arith.divf %6, %7 : vector<8x160xf32>
    %9 = vector.extract_strided_slice %8 {offsets = [0, 0], sizes = [8, 32], strides = [1, 1]} : vector<8x160xf32> to vector<8x32xf32>
    %10 = vector.extract_strided_slice %8 {offsets = [0, 32], sizes = [8, 32], strides = [1, 1]} : vector<8x160xf32> to vector<8x32xf32>
    %11 = vector.extract_strided_slice %8 {offsets = [0, 64], sizes = [8, 32], strides = [1, 1]} : vector<8x160xf32> to vector<8x32xf32>
    %12 = vector.extract_strided_slice %8 {offsets = [0, 96], sizes = [8, 32], strides = [1, 1]} : vector<8x160xf32> to vector<8x32xf32>
    %13 = vector.extract_strided_slice %8 {offsets = [0, 128], sizes = [8, 32], strides = [1, 1]} : vector<8x160xf32> to vector<8x32xf32>
    %14 = vector.extract_strided_slice %2 {offsets = [0, 160], sizes = [8, 32], strides = [1, 1]} : vector<8x256xf32> to vector<8x32xf32>
    %15 = math.tanh %14 : vector<8x32xf32>
    %16 = vector.extract_strided_slice %2 {offsets = [0, 192], sizes = [8, 32], strides = [1, 1]} : vector<8x256xf32> to vector<8x32xf32>
    %c0_4 = arith.constant 0 : index
    %c0_5 = arith.constant 0 : index
    %17 = vector.load %arg1[%c0_4, %c0_5] : memref<8x32xf32, #tpu.memory_space<vmem>>, vector<8x32xf32>
    %18 = arith.mulf %10, %17 : vector<8x32xf32>
    %19 = arith.mulf %9, %15 : vector<8x32xf32>
    %20 = arith.addf %18, %19 : vector<8x32xf32>
    %c0_6 = arith.constant 0 : index
    %c0_7 = arith.constant 0 : index
    %21 = vector.load %arg2[%c0_6, %c0_7] : memref<8x32xf32, #tpu.memory_space<vmem>>, vector<8x32xf32>
    %22 = arith.mulf %13, %21 : vector<8x32xf32>
    %23 = arith.mulf %12, %15 : vector<8x32xf32>
    %24 = arith.addf %22, %23 : vector<8x32xf32>
    %cst_8 = arith.constant 2.000000e+01 : f32
    %25 = vector.broadcast %cst_8 : f32 to vector<8x32xf32>
    %26 = arith.cmpf ogt, %16, %25 : vector<8x32xf32>
    %cst_9 = arith.constant 2.000000e+01 : f32
    %27 = vector.broadcast %cst_9 : f32 to vector<8x32xf32>
    %28 = arith.minimumf %16, %27 : vector<8x32xf32>
    %29 = math.exp %28 : vector<8x32xf32>
    %30 = math.log1p %29 : vector<8x32xf32>
    %31 = arith.select %26, %16, %30 : vector<8x32xi1>, vector<8x32xf32>
    %32 = tpu.concatenate %20, %24, %31, %11 in 1 : vector<8x32xf32>, vector<8x32xf32>, vector<8x32xf32>, vector<8x32xf32> -> vector<8x128xf32>
    %c0_10 = arith.constant 0 : index
    %c0_11 = arith.constant 0 : index
    %33 = vector.load %arg4[%c0_10, %c0_11] : memref<8x128xf32, #tpu.memory_space<vmem>>, vector<8x128xf32>
    tpu.vector_store %arg4[%c0_10, %c0_11], %32 {strides = array<i32>} : memref<8x128xf32, #tpu.memory_space<vmem>>, vector<8x128xf32>,
    return
  }
}

</mosaic_0001>

<bundles_post_ra>
// kernel: tpu_custom_call.1
= control target key start
LH: loop header
LB: loop body
LE: loop exit
PB: predicated region body
PF: predicated region fallthrough
CT: control target
= control target key end

     0   :  { %9 = vsyncpa [#allocation3], 0  ;;  %s485_s0 = inlined_call_operand.hbm [shape: f32[8,65], index: 0, kind: input, shape index: {}]   ;;  %s486_s1 = inlined_call_operand.hbm [shape: f32[8,32], index: 1, kind: input, shape index: {}]   ;;  %s487_s2 = inlined_call_operand.hbm [shape: f32[8,32], index: 2, kind: input, shape index: {}]   ;;  %s488_s3 = inlined_call_operand.hbm [shape: f32[65,256], index: 3, kind: input, shape index: {}]   ;;  %s489_s4 = inlined_call_operand.hbm [shape: f32[8,128], index: 4, kind: output, shape index: {}]  }
   0x1   :  { %10 = vsyncpa [#allocation6], 0 }
   0x2   :  { %11 = vsyncpa [#allocation9], 0  ;;  %s29_s17 = sshll.u32 %s486_s1, 4  ;;  %s30_s17 = int_to_ptr.hbm [resolvable:$true] %s29_s17 }
   0x3   :  { %12 = vsyncpa [#allocation4], 0  ;;  %s421_s18 = smov [#allocation5]   ;;  %s18_s22 = sshll.u32 %s485_s0, 4  ;;  %s19_s22 = int_to_ptr.hbm [resolvable:$true] %s18_s22 }
   0x4   :  { %s31_s19 = sshll.u32 %s421_s18, 4  ;;  %s422_s23 = smov [#allocation2]   ;;  %s32_s19 = int_to_ptr.vmem [resolvable:$true] %s31_s19 }
   0x5   :  { %34 = dma.hbm_to_vmem [thread:$0]  %s30_s17, 128, %s32_s19, [#allocation6]  }
   0x6   :  { %s20_s24 = sshll.u32 %s422_s23, 4  ;;  %s40_s27 = sshll.u32 %s487_s2, 4  ;;  %s21_s24 = int_to_ptr.vmem [resolvable:$true] %s20_s24  ;;  %s41_s27 = int_to_ptr.hbm [resolvable:$true] %s40_s27 }
   0x7   :  { %23 = dma.hbm_to_vmem [thread:$0]  %s19_s22, 128, %s21_s24, [#allocation3]  }
   0x8   :  { %s50_s29 = sshll.u32 %s488_s3, 4  ;;  %s423_s30 = smov [#allocation7]   ;;  %s51_s29 = int_to_ptr.hbm [resolvable:$true] %s50_s29 }
   0x9   :  { %s42_s5 = sshll.u32 %s423_s30, 4  ;;  %s424_s0 = smov [#allocation8]   ;;  %s43_s5 = int_to_ptr.vmem [resolvable:$true] %s42_s5 }
   0xa   :  { %45 = dma.hbm_to_vmem [thread:$0]  %s41_s27, 128, %s43_s5, [#allocation6]  }
   0xb   :  { %s52_s6 = sshll.u32 %s424_s0, 4  ;;  %s425_s7 = smov 256   ;;  %s53_s6 = int_to_ptr.vmem [resolvable:$true] %s52_s6 }
   0xc   :  { %s426_s8 = smov 16  }
   0xd   :  { %58 = dma.hbm_to_vmem [thread:$0]  %s51_s29, 2304, %s53_s6, [#allocation9], %s425_s7, %s425_s7, %s426_s8  }
   0xe   :  { %413 = dma.done.wait [#allocation3], 128  }
   0xf   :  { %414 = vsyncadd [#allocation3], 4294967168 }
  0x10   :  { %415 = dma.done.wait [#allocation6], 256  }
  0x11   :  { %416 = vsyncadd [#allocation6], 4294967040 }
  0x12   :  { %417 = dma.done.wait [#allocation9], 2304  }
  0x13   :  { %418 = vsyncadd [#allocation9], 4294964992  ;;  %vm98_vm0 = vcmask 1040384   ;;  %v93_v0 = vld [vmem:[#allocation8 + $0x88] sm:$0x1]  ;;  %v91_v1 = vld [vmem:[#allocation8 + $0x78] sm:$0xff] }
  0x14   :  { %265 = vmatpush.msk.msra.mxu1 %vm98_vm0, %v93_v0  ;;  %v89_v2 = vld [vmem:[#allocation8 + $0x68] sm:$0xff]  ;;  %v92_v3 = vld [vmem:[#allocation8 + $0x80] sm:$0x1]  ;;  %v90_v4 = vld [vmem:[#allocation8 + $0x70] sm:$0xff]  ;;  %vm94_vm1 = vcmask 531456   ;;  %s427_s2 = smov 32  }
  0x15   :  { %v87_v5 = vld [vmem:[#allocation8 + $0x58] sm:$0xff]  ;;  %263 = vmatpush.msk.msra.mxu0 %vm98_vm0, %v92_v3  ;;  %v88_v6 = vld [vmem:[#allocation8 + $0x60] sm:$0xff]  ;;  %v85_v7 = vld [vmem:[#allocation8 + $0x48] sm:$0xff]  ;;  %s428_s3 = smov 96   ;;  %s429_s9 = smov 64   ;;  %vm237_vm11 = vcmask 261120  }
  0x16   :  { %133 = vmatpush.msra.mxu1 %v91_v1  ;;  %v86_v8 = vld [vmem:[#allocation8 + $0x50] sm:$0xff]  ;;  %v83_v9 = vld [vmem:[#allocation8 + $0x38] sm:$0xff]  ;;  %v84_v10 = vld [vmem:[#allocation8 + $0x40] sm:$0xff]  ;;  %vm239_vm12 = vcmask 523264   ;;  %s430_s10 = smov [#allocation10]   ;;  %s251_s14 = sshll.u32 %s489_s4, 4  ;;  %s252_s14 = int_to_ptr.hbm [resolvable:$true] %s251_s14 }
  0x17   :  { %113 = vmatpush.msra.mxu0 %v90_v4  ;;  %v81_v11 = vld [vmem:[#allocation8 + $0x28] sm:$0xff]  ;;  %v82_v12 = vld [vmem:[#allocation8 + $0x30] sm:$0xff]  ;;  %v79_v13 = vld [vmem:[#allocation8 + $0x18] sm:$0xff]  ;;  %s249_s11 = sshll.u32 %s430_s10, 4  ;;  %vm241_vm14 = vcmask 785408   ;;  %s250_s11 = int_to_ptr.vmem [resolvable:$true] %s249_s11 }
  0x18   :  { %134 = vmatpush.msra.mxu1 %v89_v2  ;;  %v80_v14 = vld [vmem:[#allocation8 + $0x20] sm:$0xff]  ;;  %v77_v15 = vld [vmem:[#allocation8 + $0x8] sm:$0xff]  ;;  %v78_v17 = vld [vmem:[#allocation8 + $0x10] sm:$0xff] }
  0x19   :  { %114 = vmatpush.msra.mxu0 %v88_v6  ;;  %v75_v16 = vld [vmem:[#allocation2] sm:$0xff]  ;;  %v76_v18 = vld [vmem:[#allocation8] sm:$0xff]  ;;  %v184_v19 = vld [vmem:[#allocation5] sm:$0xff] }
  0x1a   :  { %135 = vmatpush.msra.mxu1 %v87_v5  ;;  %186 = vrot.lane.b32.xlu1 %v184_v19, %s427_s2  ;;  %v200_v53 = vld [vmem:[#allocation7] sm:$0xff] }
  0x1b   :  { %115 = vmatpush.msra.mxu0 %v86_v8 }
  0x1c   :  { %136 = vmatpush.msra.mxu1 %v85_v7 }
  0x1d   :  { %116 = vmatpush.msra.mxu0 %v84_v10 }
  0x1e   :  { %137 = vmatpush.msra.mxu1 %v83_v9 }
  0x1f   :  { %117 = vmatpush.msra.mxu0 %v82_v12 }
  0x20   :  { %138 = vmatpush.msra.mxu1 %v81_v11 }
  0x21   :  { %118 = vmatpush.msra.mxu0 %v80_v14 }
  0x22   :  { %139 = vmatpush.msra.mxu1 %v79_v13 }
  0x23   :  { %119 = vmatpush.msra.mxu0 %v78_v17 }
  0x24   :  { %140 = vmatpush.msra.mxu1 %v77_v15 }
  0x25   :  { %266 = vmatmul.msk.f32.vlgmr.msra.gmra.mxu1 %vm94_vm1, %v75_v16  ;;  %120 = vmatpush.msra.mxu0 %v76_v18 }
  0x26   :  { %264 = vmatmul.msk.f32.vlgmr.msra.gmra.mxu0 %vm94_vm1, %v75_v16 }
  0x8c   :  { %v187_v57 = vpop.permute.xlu1 %186 }
  0xa2   :  { %v469_v20 = vpop.f32.mrf.mxu1 }
  0xa3   :  { %279 = vtanh.f32 %v469_v20  ;;  %v122_v22 = vpop.f32.mrf.mxu0  ;;  %v268_v40 = vmul.f32 -1.442695, %v469_v20  ;;  %v212_v61 = vmin.f32 %v469_v20, 20.0  ;;  %vm211_vm13 = vcmp.gt.f32.partialorder %v469_v20, 20.0 }
  0xa4   :  { %v267_v23 = vmul.f32 -1.442695, %v122_v22 }
  0xa5   :  { %v213_v62 = vmul.f32 1.442695, %v212_v61 }
  0xa6   :  { %281 = vpow2.f32 %v267_v23 }
  0xa9   :  { %v280_v21 = vpop.eup %279 }
  0xaa   :  { %191 = vrot.lane.b32.xlu0 %v280_v21, %s428_s3 }
  0xac   :  { %v282_v24 = vpop.eup %281 }
  0xad   :  { %v151_v25 = vadd.f32 1.0, %v282_v24 }
  0xaf   :  { %283 = vrcp.f32 %v151_v25  ;;  %vm158_vm2 = vweird.f32 %v151_v25  ;;  %v164_v30 = vand.u32 2147483648, %v151_v25  ;;  %v162_v32 = vand.u32 2147483647, %v151_v25 }
  0xb0   :  { %285 = vpow2.f32 %v268_v40 }
  0xb1   :  { %v165_v33 = vor.u32 1.1754944e-38, %v164_v30  ;;  %vm163_vm5 = vcmp.eq.f32.partialorder %v162_v32, 8.507059e+37 }
  0xb2   :  { %202 = vrot.lane.b32.xlu0 %v280_v21, %s429_s9 }
  0xb5   :  { %v284_v26 = vpop.eup %283 }
  0xb6   :  { %v154_v27 = vmul.f32 %v284_v26, %v151_v25  ;;  %vm159_vm3 = vweird.f32 %v284_v26  ;;  %v286_v41 = vpop.eup %285 }
  0xb7   :  { %vm160_vm4 = vmor %vm158_vm2, %vm159_vm3  ;;  %v152_v42 = vadd.f32 1.0, %v286_v41 }
  0xb8   :  { %v155_v28 = vsub.f32 1.0, %v154_v27 }
  0xb9   :  { %287 = vrcp.f32 %v152_v42  ;;  %v179_v48 = vand.u32 2147483648, %v152_v42  ;;  %vm173_vm7 = vweird.f32 %v152_v42  ;;  %v177_v49 = vand.u32 2147483647, %v152_v42 }
  0xba   :  { %v156_v29 = vmul.f32 %v284_v26, %v155_v28  ;;  %289 = vpow2.f32 %v213_v62 }
  0xbb   :  { %v180_v51 = vor.u32 1.1754944e-38, %v179_v48  ;;  %vm178_vm9 = vcmp.eq.f32.partialorder %v177_v49, 8.507059e+37 }
  0xbc   :  { %v157_v31 = vadd.f32 %v284_v26, %v156_v29 }
  0xbe   :  { %v161_v34 = vsel %vm160_vm4, %v284_v26, %v157_v31 }
  0xbf   :  { %v166_v35 = vsel %vm163_vm5, %v165_v33, %v161_v34  ;;  %v288_v43 = vpop.eup %287 }
  0xc0   :  { %v169_v44 = vmul.f32 %v288_v43, %v152_v42  ;;  %vm174_vm6 = vweird.f32 %v288_v43  ;;  %v189_v58 = vmul.f32 %v187_v57, %v166_v35  ;;  %v290_v63 = vpop.eup %289 }
  0xc1   :  { %vm175_vm8 = vmor %vm173_vm7, %vm174_vm6  ;;  %v215_v0 = vadd.f32 1.0, %v290_v63  ;;  %v218_v1 = vmul.f32 -0.5, %v290_v63  ;;  %v221_v4 = vand.u32 2147483647, %v290_v63 }
  0xc2   :  { %v170_v45 = vsub.f32 1.0, %v169_v44 }
  0xc3   :  { %291 = vlog2.f32 %v215_v0  ;;  %v219_v3 = vadd.f32 1.0, %v218_v1  ;;  %vm222_vm10 = vcmp.lt.f32.partialorder %v221_v4, 0.0004427343 }
  0xc4   :  { %v171_v46 = vmul.f32 %v288_v43, %v170_v45 }
  0xc5   :  { %v220_v6 = vmul.f32 %v290_v63, %v219_v3 }
  0xc6   :  { %v172_v47 = vadd.f32 %v288_v43, %v171_v46 }
  0xc8   :  { %v176_v50 = vsel %vm175_vm8, %v288_v43, %v172_v47 }
  0xc9   :  { %v181_v52 = vsel %vm178_vm9, %v180_v51, %v176_v50  ;;  %v292_v2 = vpop.eup %291 }
  0xca   :  { %v201_v54 = vmul.f32 %v200_v53, %v181_v52  ;;  %v217_v5 = vmul.f32 0.6931472, %v292_v2 }
  0xcc   :  { %v223_v7 = vsel %vm222_vm10, %v220_v6, %v217_v5 }
  0xcd   :  { %v224_v10 = vsel %vm211_vm13, %v469_v20, %v223_v7 }
 0x11c   :  { %v192_v36 = vpop.permute.xlu0 %191 }
 0x11d   :  { %v194_v37 = vmul.f32 %v192_v36, %v166_v35 }
 0x11f   :  { %196 = vrot.lane.b32.xlu1 %v194_v37, %s427_s2 }
 0x124   :  { %v203_v38 = vpop.permute.xlu0 %202 }
 0x125   :  { %v205_v39 = vmul.f32 %v203_v38, %v166_v35 }
 0x127   :  { %207 = vrot.lane.b32.xlu2 %v205_v39, %s427_s2  ;;  %234 = vrot.lane.b32.xlu1 %v166_v35, %s427_s2 }
 0x181   :  { %v208_v55 = vpop.permute.xlu2 %207 }
 0x182   :  { %v210_v56 = vadd.f32 %v208_v55, %v201_v54 }
 0x184   :  { %230 = vrot.lane.b32.xlu0 %v210_v56, %s427_s2 }
 0x191   :  { %v197_v59 = vpop.permute.xlu1 %196 }
 0x192   :  { %v199_v60 = vadd.f32 %v197_v59, %v189_v58 }
 0x194   :  { %226 = vrot.lane.b32.xlu2 %v199_v60, %s428_s3 }
 0x199   :  { %v235_v12 = vpop.permute.xlu1 %234 }
 0x1ee   :  { %v227_v8 = vpop.permute.xlu2 %226 }
 0x1f6   :  { %v231_v9 = vpop.permute.xlu0 %230 }
 0x1f7   :  { %v238_v11 = vsel %vm237_vm11, %v227_v8, %v231_v9 }
 0x1f8   :  { %v240_v13 = vsel %vm239_vm12, %v238_v11, %v224_v10 }
 0x1f9   :  { %v242_v14 = vsel %vm241_vm14, %v240_v13, %v235_v12 }
 0x1fa   :  { %243 = vst [vmem:[#allocation10] sm:$0xff] %v242_v14 }
 0x1fb   :  { %254 = dma.vmem_to_hbm [thread:$0]  %s250_s11, 128, %s252_s14, [#allocation4]  }
 0x1fc   :  { %419 = dma.done.wait [#allocation4], 128  }
 0x1fd   :  { %420 = vsyncadd [#allocation4], 4294967168 }
 0x1fe   :  { %259 = vsyncpa [#allocation3], 1 }
 0x1ff   :  { %260 = vsyncpa [#allocation6], 1 }
 0x200   :  { %261 = vsyncpa [#allocation9], 1 }
 0x201   :  { %262 = vsyncpa [#allocation4], 1 }

</bundles_post_ra>
